<compile_context>
chip_gen: v6e
topology: v6e:2x2x1
jax: 0.10.0
libtpu: 0.0.40
codegen_flags: <defaults>
</compile_context>

<pallas_src>
import functools

import jax
import jax.numpy as jnp
from jax import lax
from jax.experimental import pallas as pl
from jax.experimental.pallas import tpu as pltpu


def _mha_kernel(xs_ref, xt_ref, wq_ref, bq_ref, wk_ref, wvp_ref, bp_ref, o_ref,
                *, num_heads: int, b_tile: int, seq_len: int, compute_dtype):
    xs = xs_ref[...]              # (b_tile * n, e) source tokens -> queries & keys
    xt = xt_ref[...]              # (b_tile * n, e) target tokens -> values
    rows, emb = xs.shape
    head_dim = emb // num_heads
    mx = compute_dtype            # MXU operand dtype (bf16 in production, f32 for checks)

    def head_body(h, acc):
        # Per-head projections via head-major weights (no lane slicing of activations).
        # 1/sqrt(emb) is already folded into wq/bq; the key bias cancels in softmax.
        qh = jnp.dot(xs, wq_ref[h], preferred_element_type=jnp.float32) + bq_ref[h]  # (rows, d)
        kh = jnp.dot(xs, wk_ref[h], preferred_element_type=jnp.float32)              # (rows, d)
        # Value projection fused with the output projection (Wv_h @ Wp_h) -> width e;
        # its bias was hoisted into bp in the wrapper (softmax rows sum to 1).
        vp = jnp.dot(xt, wvp_ref[h], preferred_element_type=jnp.float32)             # (rows, e)

        q3 = qh.astype(mx).reshape(b_tile, seq_len, head_dim)
        k3 = kh.astype(mx).reshape(b_tile, seq_len, head_dim)
        v3 = vp.astype(mx).reshape(b_tile, seq_len, emb)

        # energy[b, q, k] = sum_d q3[b,q,d] * k3[b,k,d]   (scale folded into q)
        energy = jnp.einsum('bqd,bkd->bqk', q3, k3,
                            preferred_element_type=jnp.float32)      # (b_tile, n, n) f32

        # Numerically stable softmax, all in f32 with an EXACT divide
        # (the approx reciprocal was the prior correctness failure).
        m = jnp.max(energy, axis=-1, keepdims=True)
        p = jnp.exp(energy - m)
        att = (p / jnp.sum(p, axis=-1, keepdims=True)).astype(mx)

        oh = jnp.einsum('bqk,bke->bqe', att, v3,
                        preferred_element_type=jnp.float32)          # (b_tile, n, e) f32
        return acc + oh.reshape(rows, emb)

    acc = lax.fori_loop(0, num_heads, head_body,
                        jnp.zeros((rows, emb), jnp.float32), unroll=True)
    o_ref[...] = (acc + bp_ref[...]).astype(o_ref.dtype)


def _detect_num_tensorcores() -> int:
    """Best-effort TensorCore count (2 on v7x, 1 on v5e/v6e); safe fallback = 1."""
    try:
        info = pltpu.get_tpu_info()
        for name in ("num_cores", "num_tensorcores", "tensorcore_count",
                     "core_count", "num_cores_per_chip"):
            v = getattr(info, name, None)
            if isinstance(v, int) and v > 0:
                return v
    except Exception:
        pass
    return 1


def _detect_vmem_bytes() -> int:
    """Best-effort per-core VMEM capacity; conservative 64 MiB (v7x) fallback."""
    try:
        info = pltpu.get_tpu_info()
        v = getattr(info, "vmem_capacity_bytes", None)
        if isinstance(v, int) and v > 0:
            return v
    except Exception:
        pass
    return 64 * 1024 * 1024


def _per_step_vmem_bytes(b_tile, n, e, num_heads, tok_bytes, w_bytes) -> int:
    """Rough per-grid-step footprint: double-buffered token/output blocks, resident
    (double-buffered) weights, and the f32 intermediates incl. the (b_tile,n,n) energy."""
    rows = b_tile * n
    d = e // num_heads
    tok = 2 * (2 * rows * e * tok_bytes)                       # xs & xt blocks
    out = 2 * rows * e * 4                                     # output block (f32)
    wts = 2 * (w_bytes * num_heads * e * (2 * d + e)           # wq, wk, wvp
               + 4 * (num_heads * d + e))                      # bq, bp (f32)
    inter = 4 * (rows * (2 * d + 2 * e)                        # qh, kh, vp, acc (f32)
                 + 2 * b_tile * n * n)                         # energy + att (f32)
    return tok + out + wts + inter


def _pick_b_tile(b, n, e, num_heads, *, target_steps, vmem_budget, tok_bytes, w_bytes):
    """Largest batch tile that (a) divides b, (b) keeps (b_tile*n) % 8 == 0 unless it is
    the full batch, (c) fits the VMEM budget, while still giving >= target_steps grid
    steps (so both v7x TensorCores get work); single-TC chips get one big step."""
    def ok(t):
        if t != b and (t * n) % 8 != 0:
            return False
        return _per_step_vmem_bytes(t, n, e, num_heads, tok_bytes, w_bytes) <= vmem_budget

    divisors = [t for t in range(b, 0, -1) if b % t == 0]
    valid = [t for t in divisors if ok(t)]
    if not valid:  # degenerate fallback: at least respect the (8,128) rule
        valid = [t for t in divisors if t == b or (t * n) % 8 == 0] or [b]
    preferred = [t for t in valid if b // t >= target_steps]
    return preferred[0] if preferred else valid[0]


def multi_head_attention_enc_dec(x_sour, x_tar, params, *, num_heads,
                                 compute_dtype=jnp.bfloat16,
                                 b_tile=None, target_grid_steps=None):
    b, n, e = x_sour.shape
    assert e % num_heads == 0
    d = e // num_heads
    wq, bq, wk, bk, wv, bv, wp, bp = params
    del bk  # exact: q.bk and bq.bk are constant along the softmax key axis -> cancel

    scale = 1.0 / (e ** 0.5)

    def head_major(w):
        # nn.Linear weight (out=e, in=e) -> W^T (in, out) -> (h, in, d), out index = h*d + j
        return w.T.reshape(e, num_heads, d).transpose(1, 0, 2)

    # Fold the softmax scale into the Q path (one-time constant transform).
    wq_h = (head_major(wq) * scale).astype(compute_dtype)          # (h, e, d)
    bq_h = (bq * scale).reshape(num_heads, 1, d).astype(jnp.float32)
    wk_h = head_major(wk).astype(compute_dtype)                    # (h, e, d), no bias

    # Fuse the per-head value projection with the output projection (exact):
    #   (x_tar @ Wv_h + bv_h) @ Wp_h == x_tar @ (Wv_h @ Wp_h) + bv_h @ Wp_h
    # NOTE: keep this fusion only while num_heads*e^2 is small (true here); at production
    # e/h use per-head d-wide values + lane-aligned concat + one (e,e) projection instead.
    wv_h = head_major(wv)                                          # (h, e, d) f32
    wp_h = wp.T.reshape(num_heads, d, e)                           # (h, d, e) f32
    wvp_h = jnp.einsum('hed,hdf->hef', wv_h, wp_h).astype(compute_dtype)  # (h, e, e)
    # Softmax rows sum to 1 -> the fused value bias is an additive constant; fold into bp.
    bp2 = (bp + bv @ wp.T).reshape(1, e).astype(jnp.float32)

    tok_bytes = jnp.dtype(compute_dtype).itemsize
    w_bytes = jnp.dtype(compute_dtype).itemsize
    if target_grid_steps is None:
        target_grid_steps = _detect_num_tensorcores()
    vmem_budget = min(_detect_vmem_bytes(), 64 * 2**20) // 3       # leave headroom
    if b_tile is None:
        b_tile = _pick_b_tile(b, n, e, num_heads,
                              target_steps=min(max(target_grid_steps, 1), b),
                              vmem_budget=vmem_budget,
                              tok_bytes=tok_bytes, w_bytes=w_bytes)
    assert b % b_tile == 0, "batch must be divisible by the batch tile"

    # Flatten (b, n, e) -> (b*n, e): projections see M = b_tile*n rows per grid step.
    xs2 = x_sour.reshape(b * n, e).astype(compute_dtype)
    xt2 = x_tar.reshape(b * n, e).astype(compute_dtype)

    rows = b_tile * n
    tok_spec = pl.BlockSpec((rows, e), lambda i: (i, 0))
    # Grid-invariant weights: constant index_map -> block stays resident across steps.
    # (At production e, also consider pipeline_mode=pl.Buffered(1) on these to halve
    #  their VMEM footprint on v7x.)
    const3 = lambda shape: pl.BlockSpec(shape, lambda i: (0, 0, 0))
    const2 = lambda shape: pl.BlockSpec(shape, lambda i: (0, 0))

    est = _per_step_vmem_bytes(b_tile, n, e, num_heads, tok_bytes, w_bytes)
    vmem_limit = int(min(max(2 * est, 32 * 2**20), 64 * 2**20))

    kernel = functools.partial(_mha_kernel, num_heads=num_heads, b_tile=b_tile,
                               seq_len=n, compute_dtype=compute_dtype)
    out = pl.pallas_call(
        kernel,
        out_shape=jax.ShapeDtypeStruct((b * n, e), x_sour.dtype),
        grid_spec=pltpu.PrefetchScalarGridSpec(
            num_scalar_prefetch=0,
            grid=(b // b_tile,),
            in_specs=[tok_spec, tok_spec,
                      const3((num_heads, e, d)), const3((num_heads, 1, d)),  # Wq_h, bq_h (scaled)
                      const3((num_heads, e, d)),                             # Wk_h
                      const3((num_heads, e, e)),                             # Wv_h @ Wp_h
                      const2((1, e))],                                       # bp + bv@Wp^T
            out_specs=tok_spec,
        ),
        compiler_params=pltpu.CompilerParams(
            dimension_semantics=("parallel",),
            vmem_limit_bytes=vmem_limit),
    )(xs2, xt2, wq_h, bq_h, wk_h, wvp_h, bp2)
    return out.reshape(b, n, e)


def _reference(x_sour, x_tar, params, *, num_heads):
    """Pure-JAX replica of the PyTorch forward (eval mode, mask=None), f32 throughout."""
    wq, bq, wk, bk, wv, bv, wp, bp = params
    b, n, e = x_sour.shape
    d = e // num_heads

    def split_heads(x):  # b n (h d) -> b h n d
        return x.reshape(b, n, num_heads, d).transpose(0, 2, 1, 3)

    q = split_heads(x_sour @ wq.T + bq)
    k = split_heads(x_sour @ wk.T + bk)
    v = split_heads(x_tar @ wv.T + bv)
    energy = jnp.einsum('bhqd,bhkd->bhqk', q, k)
    att = jax.nn.softmax(energy / (e ** 0.5), axis=-1)
    out = jnp.einsum('bhal,bhlv->bhav', att, v)
    out = out.transpose(0, 2, 1, 3).reshape(b, n, e)  # b h n d -> b n (h d)
    return out @ wp.T + bp


if __name__ == "__main__":
    emb_size, num_heads, dropout = 32, 4, 0.0
    batch, seq = 2, 8

    key = jax.random.PRNGKey(0)
    ks = jax.random.split(key, 10)
    init = 1.0 / (emb_size ** 0.5)

    # deterministic parameter init (nn.Linear shapes: weight (out, in), bias (out,))
    params = (
        jax.random.normal(ks[0], (emb_size, emb_size), jnp.float32) * init,  # Wq
        jax.random.normal(ks[1], (emb_size,), jnp.float32) * init,           # bq
        jax.random.normal(ks[2], (emb_size, emb_size), jnp.float32) * init,  # Wk
        jax.random.normal(ks[3], (emb_size,), jnp.float32) * init,           # bk
        jax.random.normal(ks[4], (emb_size, emb_size), jnp.float32) * init,  # Wv
        jax.random.normal(ks[5], (emb_size,), jnp.float32) * init,           # bv
        jax.random.normal(ks[6], (emb_size, emb_size), jnp.float32) * init,  # Wproj
        jax.random.normal(ks[7], (emb_size,), jnp.float32) * init,           # bproj
    )

    x_sour = jax.random.normal(ks[8], (batch, seq, emb_size), jnp.float32)
    x_tar = jax.random.normal(ks[9], (batch, seq, emb_size), jnp.float32)

    ref = _reference(x_sour, x_tar, params, num_heads=num_heads)

    # 1) Strict correctness gate: f32 MXU operands (kernel math is algebraically exact
    #    vs. the PyTorch module; only fp reassociation differences remain).
    out_f32 = multi_head_attention_enc_dec(
        x_sour, x_tar, params, num_heads=num_heads, compute_dtype=jnp.float32)
    out_f32 = jax.block_until_ready(out_f32)
    assert out_f32.shape == (batch, seq, emb_size)
    err_f32 = float(jnp.max(jnp.abs(out_f32 - ref)))
    assert err_f32 < 1e-3, f"f32 Pallas kernel mismatch vs reference: {err_f32}"

    # 2) Production path: bf16 MXU operands with f32 accumulation / f32 softmax.
    #    Loose sanity bound only — the remaining error is bf16 operand rounding of the
    #    energy logits amplified through softmax, not kernel logic (gated by (1) above).
    out_bf16 = multi_head_attention_enc_dec(
        x_sour, x_tar, params, num_heads=num_heads, compute_dtype=jnp.bfloat16)
    out_bf16 = jax.block_until_ready(out_bf16)
    assert out_bf16.shape == (batch, seq, emb_size)
    assert bool(jnp.all(jnp.isfinite(out_bf16)))
    err_bf16 = float(jnp.max(jnp.abs(out_bf16 - ref)))
    assert err_bf16 < 0.25, f"bf16 Pallas kernel sanity check failed: {err_bf16}"

    print("KERNEL_OK")
</pallas_src>

<mosaic_0001>
module attributes {stable_mosaic.version = 11 : i64} {
  func.func @_mha_kernel(%arg0: i32, %arg1: memref<16x32xf32, #tpu.memory_space<vmem>>, %arg2: memref<16x32xf32, #tpu.memory_space<vmem>>, %arg3: memref<4x32x8xf32, #tpu.memory_space<vmem>>, %arg4: memref<4x1x8xf32, #tpu.memory_space<vmem>>, %arg5: memref<4x32x8xf32, #tpu.memory_space<vmem>>, %arg6: memref<4x32x32xf32, #tpu.memory_space<vmem>>, %arg7: memref<1x32xf32, #tpu.memory_space<vmem>>, %arg8: memref<16x32xf32, #tpu.memory_space<vmem>>) attributes {dimension_semantics = [#tpu.dimension_semantics<parallel>], iteration_bounds = array<i64: 1>, scalar_prefetch = 0 : i64, scratch_operands = 0 : i64, tpu.core_type = #tpu.core_type<tc>, window_params = [{transform_indices = @transform_0, window_bounds = array<i64: 16, 32>}, {transform_indices = @transform_1, window_bounds = array<i64: 16, 32>}, {pipeline_mode = #tpu.pipeline_mode<synchronous>, transform_indices = @transform_2, window_bounds = array<i64: 4, 32, 8>}, {pipeline_mode = #tpu.pipeline_mode<synchronous>, transform_indices = @transform_3, window_bounds = array<i64: 4, 1, 8>}, {pipeline_mode = #tpu.pipeline_mode<synchronous>, transform_indices = @transform_4, window_bounds = array<i64: 4, 32, 8>}, {pipeline_mode = #tpu.pipeline_mode<synchronous>, transform_indices = @transform_5, window_bounds = array<i64: 4, 32, 32>}, {pipeline_mode = #tpu.pipeline_mode<synchronous>, transform_indices = @transform_6, window_bounds = array<i64: 1, 32>}, {transform_indices = @transform_7, window_bounds = array<i64: 16, 32>}]} {
    %c0 = arith.constant 0 : index
    %c0_0 = arith.constant 0 : index
    %0 = vector.load %arg1[%c0, %c0_0] : memref<16x32xf32, #tpu.memory_space<vmem>>, vector<16x32xf32>
    %c0_1 = arith.constant 0 : index
    %c0_2 = arith.constant 0 : index
    %1 = vector.load %arg2[%c0_1, %c0_2] : memref<16x32xf32, #tpu.memory_space<vmem>>, vector<16x32xf32>
    %cst = arith.constant 0.000000e+00 : f32
    %2 = vector.broadcast %cst : f32 to vector<16x32xf32>
    %c0_i32 = arith.constant 0 : i32
    %3 = arith.index_cast %c0_i32 : i32 to index
    %c0_3 = arith.constant 0 : index
    %c0_4 = arith.constant 0 : index
    %4 = vector.load %arg3[%3, %c0_3, %c0_4] : memref<4x32x8xf32, #tpu.memory_space<vmem>>, vector<1x32x8xf32>
    %5 = vector.shape_cast %4 : vector<1x32x8xf32> to vector<32x8xf32>
    %cst_5 = arith.constant dense<0.000000e+00> : vector<16x8xf32>
    %6 = tpu.matmul %0, %5, %cst_5 {dimension_numbers = #tpu.dot_dimension_numbers<[1], [0], [0], [1], [0, 0, 1, 1], [], []>} : vector<16x32xf32>, vector<32x8xf32>, vector<16x8xf32> -> vector<16x8xf32>
    %7 = arith.index_cast %c0_i32 : i32 to index
    %c0_6 = arith.constant 0 : index
    %c0_7 = arith.constant 0 : index
    %8 = vector.load %arg4[%7, %c0_6, %c0_7] : memref<4x1x8xf32, #tpu.memory_space<vmem>>, vector<1x1x8xf32>
    %9 = vector.shape_cast %8 : vector<1x1x8xf32> to vector<1x8xf32>
    %10 = vector.broadcast %9 : vector<1x8xf32> to vector<16x8xf32>
    %11 = arith.addf %6, %10 : vector<16x8xf32>
    %12 = arith.index_cast %c0_i32 : i32 to index
    %c0_8 = arith.constant 0 : index
    %c0_9 = arith.constant 0 : index
    %13 = vector.load %arg5[%12, %c0_8, %c0_9] : memref<4x32x8xf32, #tpu.memory_space<vmem>>, vector<1x32x8xf32>
    %14 = vector.shape_cast %13 : vector<1x32x8xf32> to vector<32x8xf32>
    %cst_10 = arith.constant dense<0.000000e+00> : vector<16x8xf32>
    %15 = tpu.matmul %0, %14, %cst_10 {dimension_numbers = #tpu.dot_dimension_numbers<[1], [0], [0], [1], [0, 0, 1, 1], [], []>} : vector<16x32xf32>, vector<32x8xf32>, vector<16x8xf32> -> vector<16x8xf32>
    %16 = arith.index_cast %c0_i32 : i32 to index
    %c0_11 = arith.constant 0 : index
    %c0_12 = arith.constant 0 : index
    %17 = vector.load %arg6[%16, %c0_11, %c0_12] : memref<4x32x32xf32, #tpu.memory_space<vmem>>, vector<1x32x32xf32>
    %18 = vector.shape_cast %17 : vector<1x32x32xf32> to vector<32x32xf32>
    %cst_13 = arith.constant dense<0.000000e+00> : vector<16x32xf32>
    %19 = tpu.matmul %1, %18, %cst_13 {dimension_numbers = #tpu.dot_dimension_numbers<[1], [0], [0], [1], [0, 0, 1, 1], [], []>} : vector<16x32xf32>, vector<32x32xf32>, vector<16x32xf32> -> vector<16x32xf32>
    %20 = vector.shape_cast %11 : vector<16x8xf32> to vector<2x8x8xf32>
    %21 = vector.shape_cast %15 : vector<16x8xf32> to vector<2x8x8xf32>
    %22 = vector.shape_cast %19 : vector<16x32xf32> to vector<2x8x32xf32>
    "tpu.trace_start"() <{level = 10 : i32, message = "bqd,bkd->bqk"}> : () -> ()
    %cst_14 = arith.constant dense<0.000000e+00> : vector<2x8x8xf32>
    %23 = tpu.matmul %20, %21, %cst_14 {dimension_numbers = #tpu.dot_dimension_numbers<[2], [2], [1], [1], [0, 0, 0, 1, 1, 1], [0], [0]>} : vector<2x8x8xf32>, vector<2x8x8xf32>, vector<2x8x8xf32> -> vector<2x8x8xf32>
    "tpu.trace_stop"() : () -> ()
    %cst_15 = arith.constant dense<0xFF800000> : vector<2x8xf32>
    %24 = vector.multi_reduction <maximumf>, %23, %cst_15 [2] : vector<2x8x8xf32> to vector<2x8xf32>
    %25 = vector.shape_cast %24 : vector<2x8xf32> to vector<2x8x1xf32>
    %26 = vector.broadcast %25 : vector<2x8x1xf32> to vector<2x8x8xf32>
    %27 = arith.subf %23, %26 : vector<2x8x8xf32>
    %28 = math.exp %27 : vector<2x8x8xf32>
    %cst_16 = arith.constant dense<0.000000e+00> : vector<2x8xf32>
    %29 = vector.multi_reduction <add>, %28, %cst_16 [2] : vector<2x8x8xf32> to vector<2x8xf32>
    %30 = vector.shape_cast %29 : vector<2x8xf32> to vector<2x8x1xf32>
    %31 = vector.broadcast %30 : vector<2x8x1xf32> to vector<2x8x8xf32>
    %32 = arith.divf %28, %31 : vector<2x8x8xf32>
    "tpu.trace_start"() <{level = 10 : i32, message = "bqk,bke->bqe"}> : () -> ()
    %cst_17 = arith.constant dense<0.000000e+00> : vector<2x8x32xf32>
    %33 = tpu.matmul %32, %22, %cst_17 {dimension_numbers = #tpu.dot_dimension_numbers<[2], [1], [1], [2], [0, 0, 0, 1, 1, 2], [0], [0]>} : vector<2x8x8xf32>, vector<2x8x32xf32>, vector<2x8x32xf32> -> vector<2x8x32xf32>
    "tpu.trace_stop"() : () -> ()
    %34 = vector.shape_cast %33 : vector<2x8x32xf32> to vector<16x32xf32>
    %35 = arith.addf %2, %34 : vector<16x32xf32>
    %c1_i32 = arith.constant 1 : i32
    %36 = arith.index_cast %c1_i32 : i32 to index
    %c0_18 = arith.constant 0 : index
    %c0_19 = arith.constant 0 : index
    %37 = vector.load %arg3[%36, %c0_18, %c0_19] : memref<4x32x8xf32, #tpu.memory_space<vmem>>, vector<1x32x8xf32>
    %38 = vector.shape_cast %37 : vector<1x32x8xf32> to vector<32x8xf32>
    %cst_20 = arith.constant dense<0.000000e+00> : vector<16x8xf32>
    %39 = tpu.matmul %0, %38, %cst_20 {dimension_numbers = #tpu.dot_dimension_numbers<[1], [0], [0], [1], [0, 0, 1, 1], [], []>} : vector<16x32xf32>, vector<32x8xf32>, vector<16x8xf32> -> vector<16x8xf32>
    %40 = arith.index_cast %c1_i32 : i32 to index
    %c0_21 = arith.constant 0 : index
    %c0_22 = arith.constant 0 : index
    %41 = vector.load %arg4[%40, %c0_21, %c0_22] : memref<4x1x8xf32, #tpu.memory_space<vmem>>, vector<1x1x8xf32>
    %42 = vector.shape_cast %41 : vector<1x1x8xf32> to vector<1x8xf32>
    %43 = vector.broadcast %42 : vector<1x8xf32> to vector<16x8xf32>
    %44 = arith.addf %39, %43 : vector<16x8xf32>
    %45 = arith.index_cast %c1_i32 : i32 to index
    %c0_23 = arith.constant 0 : index
    %c0_24 = arith.constant 0 : index
    %46 = vector.load %arg5[%45, %c0_23, %c0_24] : memref<4x32x8xf32, #tpu.memory_space<vmem>>, vector<1x32x8xf32>
    %47 = vector.shape_cast %46 : vector<1x32x8xf32> to vector<32x8xf32>
    %cst_25 = arith.constant dense<0.000000e+00> : vector<16x8xf32>
    %48 = tpu.matmul %0, %47, %cst_25 {dimension_numbers = #tpu.dot_dimension_numbers<[1], [0], [0], [1], [0, 0, 1, 1], [], []>} : vector<16x32xf32>, vector<32x8xf32>, vector<16x8xf32> -> vector<16x8xf32>
    %49 = arith.index_cast %c1_i32 : i32 to index
    %c0_26 = arith.constant 0 : index
    %c0_27 = arith.constant 0 : index
    %50 = vector.load %arg6[%49, %c0_26, %c0_27] : memref<4x32x32xf32, #tpu.memory_space<vmem>>, vector<1x32x32xf32>
    %51 = vector.shape_cast %50 : vector<1x32x32xf32> to vector<32x32xf32>
    %cst_28 = arith.constant dense<0.000000e+00> : vector<16x32xf32>
    %52 = tpu.matmul %1, %51, %cst_28 {dimension_numbers = #tpu.dot_dimension_numbers<[1], [0], [0], [1], [0, 0, 1, 1], [], []>} : vector<16x32xf32>, vector<32x32xf32>, vector<16x32xf32> -> vector<16x32xf32>
    %53 = vector.shape_cast %44 : vector<16x8xf32> to vector<2x8x8xf32>
    %54 = vector.shape_cast %48 : vector<16x8xf32> to vector<2x8x8xf32>
    %55 = vector.shape_cast %52 : vector<16x32xf32> to vector<2x8x32xf32>
    "tpu.trace_start"() <{level = 10 : i32, message = "bqd,bkd->bqk"}> : () -> ()
    %cst_29 = arith.constant dense<0.000000e+00> : vector<2x8x8xf32>
    %56 = tpu.matmul %53, %54, %cst_29 {dimension_numbers = #tpu.dot_dimension_numbers<[2], [2], [1], [1], [0, 0, 0, 1, 1, 1], [0], [0]>} : vector<2x8x8xf32>, vector<2x8x8xf32>, vector<2x8x8xf32> -> vector<2x8x8xf32>
    "tpu.trace_stop"() : () -> ()
    %cst_30 = arith.constant dense<0xFF800000> : vector<2x8xf32>
    %57 = vector.multi_reduction <maximumf>, %56, %cst_30 [2] : vector<2x8x8xf32> to vector<2x8xf32>
    %58 = vector.shape_cast %57 : vector<2x8xf32> to vector<2x8x1xf32>
    %59 = vector.broadcast %58 : vector<2x8x1xf32> to vector<2x8x8xf32>
    %60 = arith.subf %56, %59 : vector<2x8x8xf32>
    %61 = math.exp %60 : vector<2x8x8xf32>
    %cst_31 = arith.constant dense<0.000000e+00> : vector<2x8xf32>
    %62 = vector.multi_reduction <add>, %61, %cst_31 [2] : vector<2x8x8xf32> to vector<2x8xf32>
    %63 = vector.shape_cast %62 : vector<2x8xf32> to vector<2x8x1xf32>
    %64 = vector.broadcast %63 : vector<2x8x1xf32> to vector<2x8x8xf32>
    %65 = arith.divf %61, %64 : vector<2x8x8xf32>
    "tpu.trace_start"() <{level = 10 : i32, message = "bqk,bke->bqe"}> : () -> ()
    %cst_32 = arith.constant dense<0.000000e+00> : vector<2x8x32xf32>
    %66 = tpu.matmul %65, %55, %cst_32 {dimension_numbers = #tpu.dot_dimension_numbers<[2], [1], [1], [2], [0, 0, 0, 1, 1, 2], [0], [0]>} : vector<2x8x8xf32>, vector<2x8x32xf32>, vector<2x8x32xf32> -> vector<2x8x32xf32>
    "tpu.trace_stop"() : () -> ()
    %67 = vector.shape_cast %66 : vector<2x8x32xf32> to vector<16x32xf32>
    %68 = arith.addf %35, %67 : vector<16x32xf32>
    %c2_i32 = arith.constant 2 : i32
    %69 = arith.index_cast %c2_i32 : i32 to index
    %c0_33 = arith.constant 0 : index
    %c0_34 = arith.constant 0 : index
    %70 = vector.load %arg3[%69, %c0_33, %c0_34] : memref<4x32x8xf32, #tpu.memory_space<vmem>>, vector<1x32x8xf32>
    %71 = vector.shape_cast %70 : vector<1x32x8xf32> to vector<32x8xf32>
    %cst_35 = arith.constant dense<0.000000e+00> : vector<16x8xf32>
    %72 = tpu.matmul %0, %71, %cst_35 {dimension_numbers = #tpu.dot_dimension_numbers<[1], [0], [0], [1], [0, 0, 1, 1], [], []>} : vector<16x32xf32>, vector<32x8xf32>, vector<16x8xf32> -> vector<16x8xf32>
    %73 = arith.index_cast %c2_i32 : i32 to index
    %c0_36 = arith.constant 0 : index
    %c0_37 = arith.constant 0 : index
    %74 = vector.load %arg4[%73, %c0_36, %c0_37] : memref<4x1x8xf32, #tpu.memory_space<vmem>>, vector<1x1x8xf32>
    %75 = vector.shape_cast %74 : vector<1x1x8xf32> to vector<1x8xf32>
    %76 = vector.broadcast %75 : vector<1x8xf32> to vector<16x8xf32>
    %77 = arith.addf %72, %76 : vector<16x8xf32>
    %78 = arith.index_cast %c2_i32 : i32 to index
    %c0_38 = arith.constant 0 : index
    %c0_39 = arith.constant 0 : index
    %79 = vector.load %arg5[%78, %c0_38, %c0_39] : memref<4x32x8xf32, #tpu.memory_space<vmem>>, vector<1x32x8xf32>
    %80 = vector.shape_cast %79 : vector<1x32x8xf32> to vector<32x8xf32>
    %cst_40 = arith.constant dense<0.000000e+00> : vector<16x8xf32>
    %81 = tpu.matmul %0, %80, %cst_40 {dimension_numbers = #tpu.dot_dimension_numbers<[1], [0], [0], [1], [0, 0, 1, 1], [], []>} : vector<16x32xf32>, vector<32x8xf32>, vector<16x8xf32> -> vector<16x8xf32>
    %82 = arith.index_cast %c2_i32 : i32 to index
    %c0_41 = arith.constant 0 : index
    %c0_42 = arith.constant 0 : index
    %83 = vector.load %arg6[%82, %c0_41, %c0_42] : memref<4x32x32xf32, #tpu.memory_space<vmem>>, vector<1x32x32xf32>
    %84 = vector.shape_cast %83 : vector<1x32x32xf32> to vector<32x32xf32>
    %cst_43 = arith.constant dense<0.000000e+00> : vector<16x32xf32>
    %85 = tpu.matmul %1, %84, %cst_43 {dimension_numbers = #tpu.dot_dimension_numbers<[1], [0], [0], [1], [0, 0, 1, 1], [], []>} : vector<16x32xf32>, vector<32x32xf32>, vector<16x32xf32> -> vector<16x32xf32>
    %86 = vector.shape_cast %77 : vector<16x8xf32> to vector<2x8x8xf32>
    %87 = vector.shape_cast %81 : vector<16x8xf32> to vector<2x8x8xf32>
    %88 = vector.shape_cast %85 : vector<16x32xf32> to vector<2x8x32xf32>
    "tpu.trace_start"() <{level = 10 : i32, message = "bqd,bkd->bqk"}> : () -> ()
    %cst_44 = arith.constant dense<0.000000e+00> : vector<2x8x8xf32>
    %89 = tpu.matmul %86, %87, %cst_44 {dimension_numbers = #tpu.dot_dimension_numbers<[2], [2], [1], [1], [0, 0, 0, 1, 1, 1], [0], [0]>} : vector<2x8x8xf32>, vector<2x8x8xf32>, vector<2x8x8xf32> -> vector<2x8x8xf32>
    "tpu.trace_stop"() : () -> ()
    %cst_45 = arith.constant dense<0xFF800000> : vector<2x8xf32>
    %90 = vector.multi_reduction <maximumf>, %89, %cst_45 [2] : vector<2x8x8xf32> to vector<2x8xf32>
    %91 = vector.shape_cast %90 : vector<2x8xf32> to vector<2x8x1xf32>
    %92 = vector.broadcast %91 : vector<2x8x1xf32> to vector<2x8x8xf32>
    %93 = arith.subf %89, %92 : vector<2x8x8xf32>
    %94 = math.exp %93 : vector<2x8x8xf32>
    %cst_46 = arith.constant dense<0.000000e+00> : vector<2x8xf32>
    %95 = vector.multi_reduction <add>, %94, %cst_46 [2] : vector<2x8x8xf32> to vector<2x8xf32>
    %96 = vector.shape_cast %95 : vector<2x8xf32> to vector<2x8x1xf32>
    %97 = vector.broadcast %96 : vector<2x8x1xf32> to vector<2x8x8xf32>
    %98 = arith.divf %94, %97 : vector<2x8x8xf32>
    "tpu.trace_start"() <{level = 10 : i32, message = "bqk,bke->bqe"}> : () -> ()
    %cst_47 = arith.constant dense<0.000000e+00> : vector<2x8x32xf32>
    %99 = tpu.matmul %98, %88, %cst_47 {dimension_numbers = #tpu.dot_dimension_numbers<[2], [1], [1], [2], [0, 0, 0, 1, 1, 2], [0], [0]>} : vector<2x8x8xf32>, vector<2x8x32xf32>, vector<2x8x32xf32> -> vector<2x8x32xf32>
    "tpu.trace_stop"() : () -> ()
    %100 = vector.shape_cast %99 : vector<2x8x32xf32> to vector<16x32xf32>
    %101 = arith.addf %68, %100 : vector<16x32xf32>
    %c3_i32 = arith.constant 3 : i32
    %102 = arith.index_cast %c3_i32 : i32 to index
    %c0_48 = arith.constant 0 : index
    %c0_49 = arith.constant 0 : index
    %103 = vector.load %arg3[%102, %c0_48, %c0_49] : memref<4x32x8xf32, #tpu.memory_space<vmem>>, vector<1x32x8xf32>
    %104 = vector.shape_cast %103 : vector<1x32x8xf32> to vector<32x8xf32>
    %cst_50 = arith.constant dense<0.000000e+00> : vector<16x8xf32>
    %105 = tpu.matmul %0, %104, %cst_50 {dimension_numbers = #tpu.dot_dimension_numbers<[1], [0], [0], [1], [0, 0, 1, 1], [], []>} : vector<16x32xf32>, vector<32x8xf32>, vector<16x8xf32> -> vector<16x8xf32>
    %106 = arith.index_cast %c3_i32 : i32 to index
    %c0_51 = arith.constant 0 : index
    %c0_52 = arith.constant 0 : index
    %107 = vector.load %arg4[%106, %c0_51, %c0_52] : memref<4x1x8xf32, #tpu.memory_space<vmem>>, vector<1x1x8xf32>
    %108 = vector.shape_cast %107 : vector<1x1x8xf32> to vector<1x8xf32>
    %109 = vector.broadcast %108 : vector<1x8xf32> to vector<16x8xf32>
    %110 = arith.addf %105, %109 : vector<16x8xf32>
    %111 = arith.index_cast %c3_i32 : i32 to index
    %c0_53 = arith.constant 0 : index
    %c0_54 = arith.constant 0 : index
    %112 = vector.load %arg5[%111, %c0_53, %c0_54] : memref<4x32x8xf32, #tpu.memory_space<vmem>>, vector<1x32x8xf32>
    %113 = vector.shape_cast %112 : vector<1x32x8xf32> to vector<32x8xf32>
    %cst_55 = arith.constant dense<0.000000e+00> : vector<16x8xf32>
    %114 = tpu.matmul %0, %113, %cst_55 {dimension_numbers = #tpu.dot_dimension_numbers<[1], [0], [0], [1], [0, 0, 1, 1], [], []>} : vector<16x32xf32>, vector<32x8xf32>, vector<16x8xf32> -> vector<16x8xf32>
    %115 = arith.index_cast %c3_i32 : i32 to index
    %c0_56 = arith.constant 0 : index
    %c0_57 = arith.constant 0 : index
    %116 = vector.load %arg6[%115, %c0_56, %c0_57] : memref<4x32x32xf32, #tpu.memory_space<vmem>>, vector<1x32x32xf32>
    %117 = vector.shape_cast %116 : vector<1x32x32xf32> to vector<32x32xf32>
    %cst_58 = arith.constant dense<0.000000e+00> : vector<16x32xf32>
    %118 = tpu.matmul %1, %117, %cst_58 {dimension_numbers = #tpu.dot_dimension_numbers<[1], [0], [0], [1], [0, 0, 1, 1], [], []>} : vector<16x32xf32>, vector<32x32xf32>, vector<16x32xf32> -> vector<16x32xf32>
    %119 = vector.shape_cast %110 : vector<16x8xf32> to vector<2x8x8xf32>
    %120 = vector.shape_cast %114 : vector<16x8xf32> to vector<2x8x8xf32>
    %121 = vector.shape_cast %118 : vector<16x32xf32> to vector<2x8x32xf32>
    "tpu.trace_start"() <{level = 10 : i32, message = "bqd,bkd->bqk"}> : () -> ()
    %cst_59 = arith.constant dense<0.000000e+00> : vector<2x8x8xf32>
    %122 = tpu.matmul %119, %120, %cst_59 {dimension_numbers = #tpu.dot_dimension_numbers<[2], [2], [1], [1], [0, 0, 0, 1, 1, 1], [0], [0]>} : vector<2x8x8xf32>, vector<2x8x8xf32>, vector<2x8x8xf32> -> vector<2x8x8xf32>
    "tpu.trace_stop"() : () -> ()
    %cst_60 = arith.constant dense<0xFF800000> : vector<2x8xf32>
    %123 = vector.multi_reduction <maximumf>, %122, %cst_60 [2] : vector<2x8x8xf32> to vector<2x8xf32>
    %124 = vector.shape_cast %123 : vector<2x8xf32> to vector<2x8x1xf32>
    %125 = vector.broadcast %124 : vector<2x8x1xf32> to vector<2x8x8xf32>
    %126 = arith.subf %122, %125 : vector<2x8x8xf32>
    %127 = math.exp %126 : vector<2x8x8xf32>
    %cst_61 = arith.constant dense<0.000000e+00> : vector<2x8xf32>
    %128 = vector.multi_reduction <add>, %127, %cst_61 [2] : vector<2x8x8xf32> to vector<2x8xf32>
    %129 = vector.shape_cast %128 : vector<2x8xf32> to vector<2x8x1xf32>
    %130 = vector.broadcast %129 : vector<2x8x1xf32> to vector<2x8x8xf32>
    %131 = arith.divf %127, %130 : vector<2x8x8xf32>
    "tpu.trace_start"() <{level = 10 : i32, message = "bqk,bke->bqe"}> : () -> ()
    %cst_62 = arith.constant dense<0.000000e+00> : vector<2x8x32xf32>
    %132 = tpu.matmul %131, %121, %cst_62 {dimension_numbers = #tpu.dot_dimension_numbers<[2], [1], [1], [2], [0, 0, 0, 1, 1, 2], [0], [0]>} : vector<2x8x8xf32>, vector<2x8x32xf32>, vector<2x8x32xf32> -> vector<2x8x32xf32>
    "tpu.trace_stop"() : () -> ()
    %133 = vector.shape_cast %132 : vector<2x8x32xf32> to vector<16x32xf32>
    %134 = arith.addf %101, %133 : vector<16x32xf32>
    %c4_i32 = arith.constant 4 : i32
    %c0_63 = arith.constant 0 : index
    %c0_64 = arith.constant 0 : index
    %135 = vector.load %arg7[%c0_63, %c0_64] : memref<1x32xf32, #tpu.memory_space<vmem>>, vector<1x32xf32>
    %136 = vector.broadcast %135 : vector<1x32xf32> to vector<16x32xf32>
    %137 = arith.addf %134, %136 : vector<16x32xf32>
    %c0_65 = arith.constant 0 : index
    %c0_66 = arith.constant 0 : index
    %138 = vector.load %arg8[%c0_65, %c0_66] : memref<16x32xf32, #tpu.memory_space<vmem>>, vector<16x32xf32>
    tpu.vector_store %arg8[%c0_65, %c0_66], %137 {strides = array<i32>} : memref<16x32xf32, #tpu.memory_space<vmem>>, vector<16x32xf32>,
    return
  }
  func.func @transform_0(%arg0: i32) -> (i32, i32) {
    %c0_i32 = arith.constant 0 : i32
    %c0_i32_0 = arith.constant 0 : i32
    return %arg0, %c0_i32 : i32, i32
  }
  func.func @transform_1(%arg0: i32) -> (i32, i32) {
    %c0_i32 = arith.constant 0 : i32
    %c0_i32_0 = arith.constant 0 : i32
    return %arg0, %c0_i32 : i32, i32
  }
  func.func @transform_2(%arg0: i32) -> (i32, i32, i32) {
    %c0_i32 = arith.constant 0 : i32
    %c0_i32_0 = arith.constant 0 : i32
    %c0_i32_1 = arith.constant 0 : i32
    %c0_i32_2 = arith.constant 0 : i32
    return %c0_i32, %c0_i32_0, %c0_i32_1 : i32, i32, i32
  }
  func.func @transform_3(%arg0: i32) -> (i32, i32, i32) {
    %c0_i32 = arith.constant 0 : i32
    %c0_i32_0 = arith.constant 0 : i32
    %c0_i32_1 = arith.constant 0 : i32
    %c0_i32_2 = arith.constant 0 : i32
    return %c0_i32, %c0_i32_0, %c0_i32_1 : i32, i32, i32
  }
  func.func @transform_4(%arg0: i32) -> (i32, i32, i32) {
    %c0_i32 = arith.constant 0 : i32
    %c0_i32_0 = arith.constant 0 : i32
    %c0_i32_1 = arith.constant 0 : i32
    %c0_i32_2 = arith.constant 0 : i32
    return %c0_i32, %c0_i32_0, %c0_i32_1 : i32, i32, i32
  }
  func.func @transform_5(%arg0: i32) -> (i32, i32, i32) {
    %c0_i32 = arith.constant 0 : i32
    %c0_i32_0 = arith.constant 0 : i32
    %c0_i32_1 = arith.constant 0 : i32
    %c0_i32_2 = arith.constant 0 : i32
    return %c0_i32, %c0_i32_0, %c0_i32_1 : i32, i32, i32
  }
  func.func @transform_6(%arg0: i32) -> (i32, i32) {
    %c0_i32 = arith.constant 0 : i32
    %c0_i32_0 = arith.constant 0 : i32
    %c0_i32_1 = arith.constant 0 : i32
    return %c0_i32, %c0_i32_0 : i32, i32
  }
  func.func @transform_7(%arg0: i32) -> (i32, i32) {
    %c0_i32 = arith.constant 0 : i32
    %c0_i32_0 = arith.constant 0 : i32
    return %arg0, %c0_i32 : i32, i32
  }
}

</mosaic_0001>

<bundles_post_ra>
// kernel: tpu_custom_call.1
= control target key start
LH: loop header
LB: loop body
LE: loop exit
PB: predicated region body
PF: predicated region fallthrough
CT: control target
= control target key end

     0   :  { %s3198_s0 = inlined_call_operand.vmem [shape: f32[16,32], index: 0, kind: input, shape index: {}]   ;;  %s3199_s1 = inlined_call_operand.vmem [shape: f32[16,32], index: 1, kind: input, shape index: {}]   ;;  %s3200_s2 = inlined_call_operand.vmem [shape: f32[4,32,8], index: 2, kind: input, shape index: {}]   ;;  %s3201_s3 = inlined_call_operand.vmem [shape: f32[4,1,8], index: 3, kind: input, shape index: {}]   ;;  %s3202_s4 = inlined_call_operand.vmem [shape: f32[4,32,8], index: 4, kind: input, shape index: {}]   ;;  %s3203_s5 = inlined_call_operand.vmem [shape: f32[4,32,32], index: 5, kind: input, shape index: {}]   ;;  %s3204_s6 = inlined_call_operand.vmem [shape: f32[1,32], index: 6, kind: input, shape index: {}]   ;;  %s3205_s7 = inlined_call_operand.hbm [shape: f32[16,32], index: 7, kind: output, shape index: {}]  }
   0x1   :  { %v34_v0 = vld [vmem:[%s3200_s2 + $0x18] sm:$0xff]  ;;  %v33_v2 = vld [vmem:[%s3200_s2 + $0x10] sm:$0xff]  ;;  %v32_v4 = vld [vmem:[%s3200_s2 + $0x8] sm:$0xff] }
   0x2   :  { %v127_v1 = vld [vmem:[%s3202_s4 + $0x18] sm:$0xff]  ;;  %2544 = vmatprep.subr.mxu0 %v34_v0  ;;  %v126_v3 = vld [vmem:[%s3202_s4 + $0x10] sm:$0xff]  ;;  %v125_v5 = vld [vmem:[%s3202_s4 + $0x8] sm:$0xff] }
   0x3   :  { %2555 = vmatprep.subr.mxu1 %v127_v1  ;;  %2545 = vmatpush3.msra.mxu0 %v34_v0 }
   0x4   :  { %2556 = vmatpush3.msra.mxu1 %v127_v1  ;;  %2546 = vmatprep.subr.mxu0 %v33_v2 }
   0x5   :  { %2557 = vmatprep.subr.mxu1 %v126_v3 }
   0x6   :  { %12 = vsyncpa [#allocation3], 0  ;;  %2547 = vmatpush3.msra.mxu0 %v33_v2  ;;  %2558 = vmatpush3.msra.mxu1 %v126_v3  ;;  %v31_v6 = vld [vmem:[%s3200_s2] sm:$0xff]  ;;  %vm42_vm0 = vcmask 261120   ;;  %v2892_v9 = vld [vmem:[%s3198_s0 + $0x8] sm:$0xff]  ;;  %v2815_v10 = vmov 0.0  }
   0x7   :  { %v124_v7 = vld [vmem:[%s3202_s4] sm:$0xff]  ;;  %2548 = vmatprep.subr.mxu0 %v32_v4  ;;  %2559 = vmatprep.subr.mxu1 %v125_v5  ;;  %vm2816_vm1 = vmmov 0   ;;  %vm288_vm2 = vcmask 64512   ;;  %v206_v18 = vld [vmem:[%s3203_s5 + $0x18] sm:$0xff]  ;;  %v205_v19 = vld [vmem:[%s3203_s5 + $0x10] sm:$0xff]  ;;  %s2817_s11 = smov [#allocation2]  }
   0x8   :  { %v2887_v8 = vld [vmem:[%s3198_s0] sm:$0xff]  ;;  %2549 = vmatpush3.msra.mxu0 %v32_v4  ;;  %2560 = vmatpush3.msra.mxu1 %v125_v5  ;;  %v204_v21 = vld [vmem:[%s3203_s5 + $0x8] sm:$0xff]  ;;  %v2372_v42 = vld [vmem:[%s3202_s4 + $0x38] sm:$0xff]  ;;  %s2337_s12 = sshll.u32 %s2817_s11, 4  ;;  %s2338_s12 = int_to_ptr.vmem [resolvable:$true] %s2337_s12 }
   0x9   :  { %2550 = vmatprep.subr.mxu0 %v31_v6  ;;  %2561 = vmatprep.subr.mxu1 %v124_v7  ;;  %v2348_v12 = vld [vmem:[%s3201_s3] ss:$0 sm:$0xff]  ;;  %v2940_v23 = vld [vmem:[%s3199_s1 + $0x8] sm:$0xff]  ;;  %v2364_v43 = vld [vmem:[%s3200_s2 + $0x38] sm:$0xff]  ;;  %s2793_s13 = scalar_lea.vmem %s2338_s12, 256  ;;  %p2798_p1 = scmp.lt.s32.totalorder %s2338_s12, %s2338_s12 }
   0xa   :  { %2551 = vmatpush3.msra.mxu0 %v31_v6  ;;  %2552 = vmatprep.mubr.msk.f32.mxu0 %vm42_vm0, %v2887_v8  ;;  %v2927_v20 = vld [vmem:[%s3199_s1] sm:$0xff]  ;;  %v2371_v48 = vld [vmem:[%s3202_s4 + $0x30] sm:$0xff]  ;;  %v2370_v50 = vld [vmem:[%s3202_s4 + $0x28] sm:$0xff]  ;;  %p2794_p0 = scmp.ne.s32.totalorder %s2338_s12, %s2793_s13  ;;  %p2799_p2 = scmp.lt.s32.totalorder %s2793_s13, %s2793_s13 }
   0xb   :  { %2562 = vmatpush3.msra.mxu1 %v124_v7  ;;  %2563 = vmatprep.mubr.msk.f32.mxu1 %vm42_vm0, %v2887_v8  ;;  %v203_v22 = vld [vmem:[%s3203_s5] sm:$0xff]  ;;  %v2363_v52 = vld [vmem:[%s3200_s2 + $0x30] sm:$0xff]  ;;  %v2362_v54 = vld [vmem:[%s3200_s2 + $0x28] sm:$0xff] }
   0xc   :  { %2553 = vmatmul.mubr.msk.f32.vlgmr.msra.gmra.mxu0 %vm42_vm0, %v2892_v9  ;;  %2564 = vmatmul.mubr.msk.f32.vlgmr.msra.gmra.mxu1 %vm42_vm0, %v2892_v9  ;;  %v2369_v53 = vld [vmem:[%s3202_s4 + $0x20] sm:$0xff]  ;;  %v2378_v3 = vld [vmem:[%s3203_s5 + $0x38] sm:$0xff]  ;;  %v2377_v4 = vld [vmem:[%s3203_s5 + $0x30] sm:$0xff]  ;;  %p2800_p3 = por %p2799_p2, %p2798_p1 }
   0xd   :  { %2577 = vmatprep.subr.mxu1 %v2815_v10  ;;  %2579 = vmatprep.mubr.msk.f32.mxu1 %vm2816_vm1, %v2815_v10  ;;  %v2361_v55 = vld [vmem:[%s3200_s2 + $0x20] sm:$0xff]  ;;  %v2376_v5 = vld [vmem:[%s3203_s5 + $0x28] sm:$0xff] }
   0xe   :  { %2566 = vmatprep.subr.mxu0 %v206_v18  ;;  %2574 = vmatprep.mubr.msk.f32.mxu0 %vm42_vm0, %v2927_v20  ;;  %v2366_v63 = vld [vmem:[%s3201_s3 + $0x1] ss:$0 sm:$0xff]  ;;  %p2801_p4 = pnand %p2800_p3, %p2794_p0 }
   0xf   :  { %2567 = vmatpush3.msra.mxu0 %v206_v18  ;;  %v2375_v6 = vld [vmem:[%s3203_s5 + $0x20] sm:$0xff] }
  0x10   :  { %2568 = vmatprep.subr.mxu0 %v205_v19 }
  0x11   :  { %2569 = vmatpush3.msra.mxu0 %v205_v19 }
  0x12   :  { %2570 = vmatprep.subr.mxu0 %v204_v21 }
  0x13   :  { %2571 = vmatpush3.msra.mxu0 %v204_v21 }
  0x14   :  { %2572 = vmatprep.subr.mxu0 %v203_v22 }
  0x15   :  { %2573 = vmatpush3.msra.mxu0 %v203_v22 }
  0x16   :  { %2575 = vmatmul.mubr.msk.f32.vlgmr.msra.gmra.mxu0 %vm42_vm0, %v2940_v23  ;;  %2587 = vmatprep.subr.mxu0 %v2815_v10 }
  0x17   :  { %2589 = vmatprep.mubr.msk.f32.mxu0 %vm2816_vm1, %v2815_v10 }
  0xcc   :  { %v2554_v11 = vpop.f32.mrf.mxu0  ;;  %v2565_v13 = vpop.f32.mrf.mxu1 }
  0xcd   :  { %v121_v17 = vadd.f32 %v2554_v11, %v2348_v12 }
  0xce   :  { %v115_v14 = vpop.f32.mrf.mxu0  ;;  %v194_v15 = vpop.f32.mrf.mxu1 }
  0xcf   :  { %v116_v16 = vadd.f32 %v2348_v12, %v115_v14  ;;  %2578 = vmatpush3.xpose.msk.msra.mxu1 %vm288_vm2, %v194_v15 }
  0xd0   :  { %2582 = vmatprep.subr.mxu1 %v2815_v10 }
  0xd2   :  { %2580 = vmatmul.mubr.msk.f32.vlgmr.msra.gmra.mxu1 %vm288_vm2, %v116_v16 }
  0xd3   :  { %2583 = vmatpush3.xpose.msk.msra.mxu1 %vm288_vm2, %v2565_v13  ;;  %2584 = vmatprep.mubr.msk.f32.mxu1 %vm2816_vm1, %v2815_v10 }
  0xd4   :  { %2592 = vmatprep.subr.mxu1 %v2815_v10 }
  0xd6   :  { %2585 = vmatmul.mubr.msk.f32.vlgmr.msra.gmra.mxu1 %vm288_vm2, %v121_v17  ;;  %v2576_v40 = vpop.f32.mrf.mxu0 }
  0xd7   :  { %2594 = vmatprep.mubr.msk.f32.mxu1 %vm2816_vm1, %v2815_v10  ;;  %2593 = vmatpush3.msra.mxu1 %v2576_v40  ;;  %v2397_v40 = vld [vmem:[%s3202_s4 + $0x50] sm:$0xff] }
  0xd8   :  { %v279_v41 = vpop.f32.mrf.mxu0  ;;  %2608 = vmatprep.subr.mxu1 %v2372_v42 }
  0xd9   :  { %2588 = vmatpush3.msra.mxu0 %v279_v41  ;;  %v2387_v41 = vld [vmem:[%s3200_s2 + $0x40] sm:$0xff] }
  0xda   :  { %2597 = vmatprep.subr.mxu0 %v2364_v43 }
 0x192   :  { %v361_v24 = vpop.f32.mrf.mxu1 }
 0x193   :  { %v441_v29 = vsel %vm288_vm2, %v361_v24, -inf }
 0x194   :  { %v2581_v25 = vpop.f32.mrf.mxu1 }
 0x196   :  { %v437_v26 = vpop.f32.mrf.mxu1 }
 0x197   :  { %v444_v27 = vsel %vm288_vm2, %v437_v26, -inf }
 0x198   :  { %445 = vmax.xlane.f32.xlu0 %v444_v27  ;;  %v2586_v28 = vpop.f32.mrf.mxu1 }
 0x19c   :  { %442 = vmax.xlane.f32.xlu0 %v441_v29 }
 0x221   :  { %v446_v30 = vpop.xlane.xlu0 %445 }
 0x222   :  { %v448_v31 = vsub.f32 %v437_v26, %v446_v30  ;;  %v2390_v30 = vld [vmem:[%s3200_s2 + $0x58] sm:$0xff] }
 0x224   :  { %v451_v32 = vmul.f32 1.442695, %v448_v31  ;;  %v2398_v31 = vld [vmem:[%s3202_s4 + $0x58] sm:$0xff] }
 0x225   :  { %v443_v33 = vpop.xlane.xlu0 %442 }
 0x226   :  { %2761 = vpow2.f32 %v451_v32  ;;  %v447_v34 = vsub.f32 %v361_v24, %v443_v33 }
 0x228   :  { %v449_v35 = vmul.f32 1.442695, %v447_v34 }
 0x22a   :  { %2763 = vpow2.f32 %v449_v35 }
 0x233   :  { %v2762_v36 = vpop.eup %2761 }
 0x234   :  { %v456_v37 = vsel %vm288_vm2, %v2762_v36, 0.0 }
 0x235   :  { %457 = vadd.xlane.f32.xlu1 %v456_v37 }
 0x237   :  { %v2764_v38 = vpop.eup %2763 }
 0x238   :  { %v453_v39 = vsel %vm288_vm2, %v2764_v38, 0.0 }
 0x239   :  { %454 = vadd.xlane.f32.xlu1 %v453_v39 }
 0x2be   :  { %v458_v44 = vpop.xlane.xlu1 %457 }
 0x2bf   :  { %2765 = vrcp.f32 %v458_v44 }
 0x2c2   :  { %v455_v45 = vpop.xlane.xlu1 %454 }
 0x2c3   :  { %2767 = vrcp.f32 %v455_v45 }
 0x2cc   :  { %v2766_v46 = vpop.eup %2765 }
 0x2cd   :  { %v462_v47 = vmul.f32 %v2766_v46, %v2762_v36  ;;  %v2389_v36 = vld [vmem:[%s3200_s2 + $0x50] sm:$0xff] }
 0x2cf   :  { %2595 = vmatmul.mubr.msk.f32.vlgmr.msra.gmra.mxu1 %vm288_vm2, %v462_v47 }
 0x2d0   :  { %v2768_v49 = vpop.eup %2767  ;;  %2609 = vmatpush3.msra.mxu1 %v2372_v42  ;;  %2616 = vmatprep.mubr.msk.f32.mxu1 %vm42_vm0, %v2887_v8  ;;  %v2396_v42 = vld [vmem:[%s3202_s4 + $0x48] sm:$0xff] }
 0x2d1   :  { %2610 = vmatprep.subr.mxu1 %v2371_v48  ;;  %v460_v51 = vmul.f32 %v2768_v49, %v2764_v38  ;;  %v2388_v38 = vld [vmem:[%s3200_s2 + $0x48] sm:$0xff] }
 0x2d2   :  { %2611 = vmatpush3.msra.mxu1 %v2371_v48 }
 0x2d3   :  { %2590 = vmatmul.mubr.msk.f32.vlgmr.msra.gmra.mxu0 %vm288_vm2, %v460_v51  ;;  %2612 = vmatprep.subr.mxu1 %v2370_v50 }
 0x2d4   :  { %2598 = vmatpush3.msra.mxu0 %v2364_v43  ;;  %2613 = vmatpush3.msra.mxu1 %v2370_v50  ;;  %v2395_v43 = vld [vmem:[%s3202_s4 + $0x40] sm:$0xff] }
 0x2d5   :  { %2599 = vmatprep.subr.mxu0 %v2363_v52  ;;  %2614 = vmatprep.subr.mxu1 %v2369_v53  ;;  %v2392_v50 = vld [vmem:[%s3201_s3 + $0x2] ss:$0 sm:$0xff] }
 0x2d6   :  { %2600 = vmatpush3.msra.mxu0 %v2363_v52  ;;  %2615 = vmatpush3.msra.mxu1 %v2369_v53 }
 0x2d7   :  { %2601 = vmatprep.subr.mxu0 %v2362_v54  ;;  %2617 = vmatmul.mubr.msk.f32.vlgmr.msra.gmra.mxu1 %vm42_vm0, %v2892_v9 }
 0x2d8   :  { %2602 = vmatpush3.msra.mxu0 %v2362_v54  ;;  %2605 = vmatprep.mubr.msk.f32.mxu0 %vm42_vm0, %v2887_v8 }
 0x2d9   :  { %2603 = vmatprep.subr.mxu0 %v2361_v55  ;;  %2630 = vmatprep.subr.mxu1 %v2815_v10 }
 0x2da   :  { %2604 = vmatpush3.msra.mxu0 %v2361_v55  ;;  %2632 = vmatprep.mubr.msk.f32.mxu1 %vm2816_vm1, %v2815_v10  ;;  %v2404_v55 = vld [vmem:[%s3203_s5 + $0x58] sm:$0xff] }
 0x2db   :  { %2606 = vmatmul.mubr.msk.f32.vlgmr.msra.gmra.mxu0 %vm42_vm0, %v2892_v9  ;;  %2619 = vmatprep.subr.mxu0 %v2378_v3 }
 0x2dc   :  { %2627 = vmatprep.mubr.msk.f32.mxu0 %vm42_vm0, %v2927_v20  ;;  %2620 = vmatpush3.msra.mxu0 %v2378_v3 }
 0x2dd   :  { %2621 = vmatprep.subr.mxu0 %v2377_v4 }
 0x2de   :  { %2622 = vmatpush3.msra.mxu0 %v2377_v4 }
 0x2df   :  { %2623 = vmatprep.subr.mxu0 %v2376_v5 }
 0x2e0   :  { %2624 = vmatpush3.msra.mxu0 %v2376_v5 }
 0x2e1   :  { %2625 = vmatprep.subr.mxu0 %v2375_v6 }
 0x2e2   :  { %2626 = vmatpush3.msra.mxu0 %v2375_v6 }
 0x2e3   :  { %2628 = vmatmul.mubr.msk.f32.vlgmr.msra.gmra.mxu0 %vm42_vm0, %v2940_v23  ;;  %2640 = vmatprep.subr.mxu0 %v2815_v10 }
 0x2e4   :  { %2642 = vmatprep.mubr.msk.f32.mxu0 %vm2816_vm1, %v2815_v10 }
 0x38f   :  { %v2990_v56 = vpop.f32.mrf.mxu1 }
 0x391   :  { %v2596_v57 = vpop.f32.mrf.mxu1 }
 0x392   :  { %v2403_v57 = vld [vmem:[%s3203_s5 + $0x50] sm:$0xff] }
 0x393   :  { %v2992_v58 = vpop.f32.mrf.mxu0 }
 0x395   :  { %v2591_v59 = vpop.f32.mrf.mxu0 }
 0x396   :  { %v2402_v59 = vld [vmem:[%s3203_s5 + $0x48] sm:$0xff] }
 0x397   :  { %v2618_v60 = vpop.f32.mrf.mxu1 }
 0x399   :  { %v770_v61 = vpop.f32.mrf.mxu1 }
 0x39a   :  { %2631 = vmatpush3.xpose.msk.msra.mxu1 %vm288_vm2, %v770_v61 }
 0x39b   :  { %v2607_v62 = vpop.f32.mrf.mxu0  ;;  %2635 = vmatprep.subr.mxu1 %v2815_v10 }
 0x39c   :  { %v696_v2 = vadd.f32 %v2607_v62, %v2366_v63 }
 0x39d   :  { %v690_v0 = vpop.f32.mrf.mxu0 }
 0x39e   :  { %v691_v1 = vadd.f32 %v2366_v63, %v690_v0 }
 0x3a0   :  { %2633 = vmatmul.mubr.msk.f32.vlgmr.msra.gmra.mxu1 %vm288_vm2, %v691_v1 }
 0x3a1   :  { %2636 = vmatpush3.xpose.msk.msra.mxu1 %vm288_vm2, %v2618_v60  ;;  %2637 = vmatprep.mubr.msk.f32.mxu1 %vm2816_vm1, %v2815_v10  ;;  %v2401_v60 = vld [vmem:[%s3203_s5 + $0x40] sm:$0xff] }
 0x3a2   :  { %2645 = vmatprep.subr.mxu1 %v2815_v10 }
 0x3a3   :  { %v2629_v28 = vpop.f32.mrf.mxu0 }
 0x3a4   :  { %2638 = vmatmul.mubr.msk.f32.vlgmr.msra.gmra.mxu1 %vm288_vm2, %v696_v2 }
 0x3a5   :  { %2647 = vmatprep.mubr.msk.f32.mxu1 %vm2816_vm1, %v2815_v10  ;;  %2646 = vmatpush3.msra.mxu1 %v2629_v28  ;;  %v850_v29 = vpop.f32.mrf.mxu0  ;;  %v2414_v28 = vld [vmem:[%s3200_s2 + $0x68] sm:$0xff] }
 0x3a6   :  { %2641 = vmatpush3.msra.mxu0 %v850_v29  ;;  %2661 = vmatprep.subr.mxu1 %v2398_v31 }
 0x3a7   :  { %2650 = vmatprep.subr.mxu0 %v2390_v30 }
 0x460   :  { %v931_v7 = vpop.f32.mrf.mxu1 }
 0x461   :  { %v1011_v11 = vsel %vm288_vm2, %v931_v7, -inf }
 0x462   :  { %1012 = vmax.xlane.f32.xlu1 %v1011_v11  ;;  %v2634_v12 = vpop.f32.mrf.mxu1 }
 0x464   :  { %v1007_v13 = vpop.f32.mrf.mxu1 }
 0x465   :  { %v1014_v14 = vsel %vm288_vm2, %v1007_v13, -inf }
 0x466   :  { %1015 = vmax.xlane.f32.xlu0 %v1014_v14  ;;  %v2639_v15 = vpop.f32.mrf.mxu1 }
 0x4eb   :  { %v1013_v16 = vpop.xlane.xlu1 %1012 }
 0x4ec   :  { %v1017_v17 = vsub.f32 %v931_v7, %v1013_v16 }
 0x4ee   :  { %v1019_v18 = vmul.f32 1.442695, %v1017_v17 }
 0x4ef   :  { %v1016_v19 = vpop.xlane.xlu0 %1015 }
 0x4f0   :  { %2769 = vpow2.f32 %v1019_v18  ;;  %v1018_v21 = vsub.f32 %v1007_v13, %v1016_v19  ;;  %v2416_v18 = vld [vmem:[%s3200_s2 + $0x78] sm:$0xff] }
 0x4f1   :  { %v2424_v19 = vld [vmem:[%s3202_s4 + $0x78] sm:$0xff] }
 0x4f2   :  { %v1021_v22 = vmul.f32 1.442695, %v1018_v21 }
 0x4f4   :  { %2771 = vpow2.f32 %v1021_v22 }
 0x4fd   :  { %v2770_v24 = vpop.eup %2769 }
 0x4fe   :  { %v1023_v25 = vsel %vm288_vm2, %v2770_v24, 0.0 }
 0x4ff   :  { %1024 = vadd.xlane.f32.xlu1 %v1023_v25 }
 0x501   :  { %v2772_v26 = vpop.eup %2771 }
 0x502   :  { %v1026_v27 = vsel %vm288_vm2, %v2772_v26, 0.0 }
 0x503   :  { %1027 = vadd.xlane.f32.xlu0 %v1026_v27 }
 0x588   :  { %v1025_v32 = vpop.xlane.xlu1 %1024 }
 0x589   :  { %2773 = vrcp.f32 %v1025_v32  ;;  %v2422_v32 = vld [vmem:[%s3202_s4 + $0x68] sm:$0xff] }
 0x58c   :  { %v1028_v33 = vpop.xlane.xlu0 %1027 }
 0x58d   :  { %2775 = vrcp.f32 %v1028_v33  ;;  %v2421_v33 = vld [vmem:[%s3202_s4 + $0x60] sm:$0xff] }
 0x596   :  { %v2774_v34 = vpop.eup %2773 }
 0x597   :  { %v1030_v35 = vmul.f32 %v2774_v34, %v2770_v24 }
 0x599   :  { %2643 = vmatmul.mubr.msk.f32.vlgmr.msra.gmra.mxu0 %vm288_vm2, %v1030_v35 }
 0x59a   :  { %v2776_v37 = vpop.eup %2775  ;;  %2651 = vmatpush3.msra.mxu0 %v2390_v30  ;;  %2658 = vmatprep.mubr.msk.f32.mxu0 %vm42_vm0, %v2887_v8  ;;  %v2423_v30 = vld [vmem:[%s3202_s4 + $0x70] sm:$0xff] }
 0x59b   :  { %v1032_v39 = vmul.f32 %v2776_v37, %v2772_v26  ;;  %2652 = vmatprep.subr.mxu0 %v2389_v36  ;;  %v2415_v26 = vld [vmem:[%s3200_s2 + $0x70] sm:$0xff] }
 0x59c   :  { %2653 = vmatpush3.msra.mxu0 %v2389_v36 }
 0x59d   :  { %2648 = vmatmul.mubr.msk.f32.vlgmr.msra.gmra.mxu1 %vm288_vm2, %v1032_v39  ;;  %2654 = vmatprep.subr.mxu0 %v2388_v38 }
 0x59e   :  { %2662 = vmatpush3.msra.mxu1 %v2398_v31  ;;  %2655 = vmatpush3.msra.mxu0 %v2388_v38  ;;  %v2413_v31 = vld [vmem:[%s3200_s2 + $0x60] sm:$0xff] }
 0x59f   :  { %2663 = vmatprep.subr.mxu1 %v2397_v40  ;;  %2656 = vmatprep.subr.mxu0 %v2387_v41 }
 0x5a0   :  { %2664 = vmatpush3.msra.mxu1 %v2397_v40  ;;  %2657 = vmatpush3.msra.mxu0 %v2387_v41  ;;  %v2418_v41 = vld [vmem:[%s3201_s3 + $0x3] ss:$0 sm:$0xff] }
 0x5a1   :  { %2665 = vmatprep.subr.mxu1 %v2396_v42  ;;  %2659 = vmatmul.mubr.msk.f32.vlgmr.msra.gmra.mxu0 %vm42_vm0, %v2892_v9 }
 0x5a2   :  { %2666 = vmatpush3.msra.mxu1 %v2396_v42  ;;  %2669 = vmatprep.mubr.msk.f32.mxu1 %vm42_vm0, %v2887_v8 }
 0x5a3   :  { %2667 = vmatprep.subr.mxu1 %v2395_v43  ;;  %2680 = vmatprep.mubr.msk.f32.mxu0 %vm42_vm0, %v2927_v20 }
 0x5a4   :  { %2668 = vmatpush3.msra.mxu1 %v2395_v43  ;;  %2672 = vmatprep.subr.mxu0 %v2404_v55 }
 0x5a5   :  { %2670 = vmatmul.mubr.msk.f32.vlgmr.msra.gmra.mxu1 %vm42_vm0, %v2892_v9  ;;  %2683 = vmatprep.subr.mxu1 %v2815_v10 }
 0x5a6   :  { %2685 = vmatprep.mubr.msk.f32.mxu1 %vm2816_vm1, %v2815_v10  ;;  %2673 = vmatpush3.msra.mxu0 %v2404_v55 }
 0x5a7   :  { %2674 = vmatprep.subr.mxu0 %v2403_v57 }
 0x5a8   :  { %2675 = vmatpush3.msra.mxu0 %v2403_v57 }
 0x5a9   :  { %2676 = vmatprep.subr.mxu0 %v2402_v59 }
 0x5aa   :  { %2677 = vmatpush3.msra.mxu0 %v2402_v59 }
 0x5ab   :  { %2678 = vmatprep.subr.mxu0 %v2401_v60 }
 0x5ac   :  { %2679 = vmatpush3.msra.mxu0 %v2401_v60 }
 0x5ad   :  { %2681 = vmatmul.mubr.msk.f32.vlgmr.msra.gmra.mxu0 %vm42_vm0, %v2940_v23  ;;  %2693 = vmatprep.subr.mxu0 %v2815_v10 }
 0x5ae   :  { %2695 = vmatprep.mubr.msk.f32.mxu0 %vm2816_vm1, %v2815_v10 }
 0x659   :  { %v3067_v44 = vpop.f32.mrf.mxu0 }
 0x65b   :  { %v2644_v45 = vpop.f32.mrf.mxu0 }
 0x65c   :  { %v2429_v45 = vld [vmem:[%s3203_s5 + $0x70] sm:$0xff] }
 0x65d   :  { %v3069_v46 = vpop.f32.mrf.mxu1 }
 0x65e   :  { %v1180_v37 = vadd.f32 %v3069_v46, %v2990_v56  ;;  %v2428_v46 = vld [vmem:[%s3203_s5 + $0x68] sm:$0xff] }
 0x65f   :  { %v2649_v47 = vpop.f32.mrf.mxu1 }
 0x660   :  { %v2427_v47 = vld [vmem:[%s3203_s5 + $0x60] sm:$0xff] }
 0x661   :  { %v2660_v48 = vpop.f32.mrf.mxu0 }
 0x662   :  { %v1266_v54 = vadd.f32 %v2660_v48, %v2392_v50 }
 0x663   :  { %v1260_v51 = vpop.f32.mrf.mxu0 }
 0x664   :  { %v1261_v53 = vadd.f32 %v2392_v50, %v1260_v51 }
 0x665   :  { %v2671_v49 = vpop.f32.mrf.mxu1 }
 0x667   :  { %v1340_v52 = vpop.f32.mrf.mxu1 }
 0x668   :  { %2684 = vmatpush3.xpose.msk.msra.mxu1 %vm288_vm2, %v1340_v52 }
 0x669   :  { %2688 = vmatprep.subr.mxu1 %v2815_v10 }
 0x66b   :  { %2686 = vmatmul.mubr.msk.f32.vlgmr.msra.gmra.mxu1 %vm288_vm2, %v1261_v53 }
 0x66c   :  { %2689 = vmatpush3.xpose.msk.msra.mxu1 %vm288_vm2, %v2671_v49  ;;  %2690 = vmatprep.mubr.msk.f32.mxu1 %vm2816_vm1, %v2815_v10 }
 0x66d   :  { %2698 = vmatprep.subr.mxu1 %v2815_v10  ;;  %v2682_v16 = vpop.f32.mrf.mxu0 }
 0x66f   :  { %2691 = vmatmul.mubr.msk.f32.vlgmr.msra.gmra.mxu1 %vm288_vm2, %v1266_v54  ;;  %v1420_v17 = vpop.f32.mrf.mxu0 }
 0x670   :  { %2700 = vmatprep.mubr.msk.f32.mxu1 %vm2816_vm1, %v2815_v10  ;;  %2699 = vmatpush3.msra.mxu1 %v2682_v16 }
 0x671   :  { %2694 = vmatpush3.msra.mxu0 %v1420_v17  ;;  %2714 = vmatprep.subr.mxu1 %v2424_v19 }
 0x672   :  { %2703 = vmatprep.subr.mxu0 %v2416_v18 }
 0x72b   :  { %v1501_v61 = vpop.f32.mrf.mxu1 }
 0x72c   :  { %v1581_v62 = vsel %vm288_vm2, %v1501_v61, -inf }
 0x72d   :  { %1582 = vmax.xlane.f32.xlu1 %v1581_v62  ;;  %v2687_v63 = vpop.f32.mrf.mxu1 }
 0x72f   :  { %v1577_v0 = vpop.f32.mrf.mxu1 }
 0x730   :  { %v1584_v1 = vsel %vm288_vm2, %v1577_v0, -inf }
 0x731   :  { %1585 = vmax.xlane.f32.xlu0 %v1584_v1  ;;  %v2692_v2 = vpop.f32.mrf.mxu1 }
 0x7b6   :  { %v1583_v3 = vpop.xlane.xlu1 %1582 }
 0x7b7   :  { %v1587_v4 = vsub.f32 %v1501_v61, %v1583_v3 }
 0x7b9   :  { %v1589_v5 = vmul.f32 1.442695, %v1587_v4 }
 0x7ba   :  { %v1586_v6 = vpop.xlane.xlu0 %1585 }
 0x7bb   :  { %2777 = vpow2.f32 %v1589_v5  ;;  %v1588_v7 = vsub.f32 %v1577_v0, %v1586_v6 }
 0x7bd   :  { %v1591_v11 = vmul.f32 1.442695, %v1588_v7 }
 0x7bf   :  { %2779 = vpow2.f32 %v1591_v11 }
 0x7c8   :  { %v2778_v12 = vpop.eup %2777 }
 0x7c9   :  { %v1593_v13 = vsel %vm288_vm2, %v2778_v12, 0.0 }
 0x7ca   :  { %1594 = vadd.xlane.f32.xlu1 %v1593_v13 }
 0x7cc   :  { %v2780_v14 = vpop.eup %2779 }
 0x7cd   :  { %v1596_v15 = vsel %vm288_vm2, %v2780_v14, 0.0 }
 0x7ce   :  { %1597 = vadd.xlane.f32.xlu0 %v1596_v15 }
 0x853   :  { %v1595_v21 = vpop.xlane.xlu1 %1594 }
 0x854   :  { %2781 = vrcp.f32 %v1595_v21 }
 0x857   :  { %v1598_v22 = vpop.xlane.xlu0 %1597 }
 0x858   :  { %2783 = vrcp.f32 %v1598_v22 }
 0x861   :  { %v2782_v24 = vpop.eup %2781 }
 0x862   :  { %v1600_v25 = vmul.f32 %v2782_v24, %v2778_v12  ;;  %v2439_v12 = vld [vmem:[%s3204_s6] ss:$0 sm:$0xff] }
 0x864   :  { %2696 = vmatmul.mubr.msk.f32.vlgmr.msra.gmra.mxu0 %vm288_vm2, %v1600_v25 }
 0x865   :  { %v2784_v27 = vpop.eup %2783  ;;  %2704 = vmatpush3.msra.mxu0 %v2416_v18  ;;  %2711 = vmatprep.mubr.msk.f32.mxu0 %vm42_vm0, %v2887_v8 }
 0x866   :  { %v1602_v29 = vmul.f32 %v2784_v27, %v2780_v14  ;;  %2705 = vmatprep.subr.mxu0 %v2415_v26 }
 0x867   :  { %2706 = vmatpush3.msra.mxu0 %v2415_v26 }
 0x868   :  { %2701 = vmatmul.mubr.msk.f32.vlgmr.msra.gmra.mxu1 %vm288_vm2, %v1602_v29  ;;  %2707 = vmatprep.subr.mxu0 %v2414_v28 }
 0x869   :  { %2715 = vmatpush3.msra.mxu1 %v2424_v19  ;;  %2708 = vmatpush3.msra.mxu0 %v2414_v28 }
 0x86a   :  { %2716 = vmatprep.subr.mxu1 %v2423_v30  ;;  %2709 = vmatprep.subr.mxu0 %v2413_v31 }
 0x86b   :  { %2717 = vmatpush3.msra.mxu1 %v2423_v30  ;;  %2710 = vmatpush3.msra.mxu0 %v2413_v31 }
 0x86c   :  { %2718 = vmatprep.subr.mxu1 %v2422_v32  ;;  %2722 = vmatprep.mubr.msk.f32.mxu1 %vm42_vm0, %v2887_v8  ;;  %v1179_v8 = vadd.f32 %v3067_v44, %v2992_v58  ;;  %v2430_v44 = vld [vmem:[%s3203_s5 + $0x78] sm:$0xff] }
 0x86d   :  { %2719 = vmatpush3.msra.mxu1 %v2422_v32  ;;  %2712 = vmatmul.mubr.msk.f32.vlgmr.msra.gmra.mxu0 %vm42_vm0, %v2892_v9 }
 0x86e   :  { %2720 = vmatprep.subr.mxu1 %v2421_v33  ;;  %2733 = vmatprep.mubr.msk.f32.mxu0 %vm42_vm0, %v2927_v20 }
 0x86f   :  { %2721 = vmatpush3.msra.mxu1 %v2421_v33  ;;  %2725 = vmatprep.subr.mxu0 %v2430_v44 }
 0x870   :  { %2723 = vmatmul.mubr.msk.f32.vlgmr.msra.gmra.mxu1 %vm42_vm0, %v2892_v9  ;;  %2736 = vmatprep.subr.mxu1 %v2815_v10 }
 0x871   :  { %2738 = vmatprep.mubr.msk.f32.mxu1 %vm2816_vm1, %v2815_v10  ;;  %2726 = vmatpush3.msra.mxu0 %v2430_v44 }
 0x872   :  { %2727 = vmatprep.subr.mxu0 %v2429_v45 }
 0x873   :  { %2728 = vmatpush3.msra.mxu0 %v2429_v45 }
 0x874   :  { %2729 = vmatprep.subr.mxu0 %v2428_v46 }
 0x875   :  { %2730 = vmatpush3.msra.mxu0 %v2428_v46 }
 0x876   :  { %2731 = vmatprep.subr.mxu0 %v2427_v47 }
 0x877   :  { %2732 = vmatpush3.msra.mxu0 %v2427_v47 }
 0x878   :  { %2734 = vmatmul.mubr.msk.f32.vlgmr.msra.gmra.mxu0 %vm42_vm0, %v2940_v23  ;;  %2746 = vmatprep.subr.mxu0 %v2815_v10 }
 0x879   :  { %2748 = vmatprep.mubr.msk.f32.mxu0 %vm2816_vm1, %v2815_v10 }
 0x924   :  { %v1672_v34 = vpop.f32.mrf.mxu0 }
 0x925   :  { %v3146_v35 = vadd.f32 %v1672_v34, %v1179_v8 }
 0x926   :  { %v2697_v36 = vpop.f32.mrf.mxu0 }
 0x928   :  { %v1745_v20 = vpop.f32.mrf.mxu1 }
 0x929   :  { %v3150_v38 = vadd.f32 %v1745_v20, %v1180_v37 }
 0x92a   :  { %v2702_v39 = vpop.f32.mrf.mxu1 }
 0x92d   :  { %v2713_v9 = vpop.f32.mrf.mxu0 }
 0x92e   :  { %v1836_v56 = vadd.f32 %v2713_v9, %v2418_v41 }
 0x92f   :  { %v1830_v42 = vpop.f32.mrf.mxu0 }
 0x930   :  { %v2724_v40 = vpop.f32.mrf.mxu1  ;;  %v1831_v58 = vadd.f32 %v2418_v41, %v1830_v42 }
 0x932   :  { %v1910_v43 = vpop.f32.mrf.mxu1 }
 0x933   :  { %2737 = vmatpush3.xpose.msk.msra.mxu1 %vm288_vm2, %v1910_v43 }
 0x934   :  { %2741 = vmatprep.subr.mxu1 %v2815_v10 }
 0x936   :  { %2739 = vmatmul.mubr.msk.f32.vlgmr.msra.gmra.mxu1 %vm288_vm2, %v1831_v58 }
 0x937   :  { %2742 = vmatpush3.xpose.msk.msra.mxu1 %vm288_vm2, %v2724_v40  ;;  %2743 = vmatprep.mubr.msk.f32.mxu1 %vm2816_vm1, %v2815_v10 }
 0x938   :  { %2751 = vmatprep.subr.mxu1 %v2815_v10  ;;  %v2735_v0 = vpop.f32.mrf.mxu0 }
 0x93a   :  { %2744 = vmatmul.mubr.msk.f32.vlgmr.msra.gmra.mxu1 %vm288_vm2, %v1836_v56  ;;  %v1990_v1 = vpop.f32.mrf.mxu0 }
 0x93b   :  { %2753 = vmatprep.mubr.msk.f32.mxu1 %vm2816_vm1, %v2815_v10  ;;  %2752 = vmatpush3.msra.mxu1 %v2735_v0 }
 0x93c   :  { %2747 = vmatpush3.msra.mxu0 %v1990_v1 }
 0x9f6   :  { %v2071_v48 = vpop.f32.mrf.mxu1 }
 0x9f7   :  { %v2151_v49 = vsel %vm288_vm2, %v2071_v48, -inf }
 0x9f8   :  { %2152 = vmax.xlane.f32.xlu0 %v2151_v49  ;;  %v2740_v50 = vpop.f32.mrf.mxu1 }
 0x9fa   :  { %v2147_v51 = vpop.f32.mrf.mxu1 }
 0x9fb   :  { %v2154_v52 = vsel %vm288_vm2, %v2147_v51, -inf }
 0x9fc   :  { %2155 = vmax.xlane.f32.xlu1 %v2154_v52  ;;  %v2745_v53 = vpop.f32.mrf.mxu1 }
 0xa81   :  { %v2153_v54 = vpop.xlane.xlu0 %2152 }
 0xa82   :  { %v2157_v55 = vsub.f32 %v2071_v48, %v2153_v54 }
 0xa84   :  { %v2159_v57 = vmul.f32 1.442695, %v2157_v55 }
 0xa85   :  { %v2156_v59 = vpop.xlane.xlu1 %2155 }
 0xa86   :  { %2785 = vpow2.f32 %v2159_v57  ;;  %v2158_v23 = vsub.f32 %v2147_v51, %v2156_v59 }
 0xa88   :  { %v2161_v60 = vmul.f32 1.442695, %v2158_v23 }
 0xa8a   :  { %2787 = vpow2.f32 %v2161_v60 }
 0xa93   :  { %v2786_v61 = vpop.eup %2785 }
 0xa94   :  { %v2163_v10 = vsel %vm288_vm2, %v2786_v61, 0.0 }
 0xa95   :  { %2164 = vadd.xlane.f32.xlu0 %v2163_v10 }
 0xa97   :  { %v2788_v62 = vpop.eup %2787 }
 0xa98   :  { %v2166_v63 = vsel %vm288_vm2, %v2788_v62, 0.0 }
 0xa99   :  { %2167 = vadd.xlane.f32.xlu1 %v2166_v63 }
 0xb1e   :  { %v2165_v2 = vpop.xlane.xlu0 %2164 }
 0xb1f   :  { %2789 = vrcp.f32 %v2165_v2 }
 0xb22   :  { %v2168_v3 = vpop.xlane.xlu1 %2167 }
 0xb23   :  { %2791 = vrcp.f32 %v2168_v3 }
 0xb2c   :  { %v2790_v4 = vpop.eup %2789 }
 0xb2d   :  { %v2170_v5 = vmul.f32 %v2790_v4, %v2786_v61 }
 0xb2f   :  { %2749 = vmatmul.mubr.msk.f32.vlgmr.msra.gmra.mxu0 %vm288_vm2, %v2170_v5 }
 0xb30   :  { %v2792_v6 = vpop.eup %2791 }
 0xb31   :  { %v2172_v7 = vmul.f32 %v2792_v6, %v2788_v62 }
 0xb33   :  { %2754 = vmatmul.mubr.msk.f32.vlgmr.msra.gmra.mxu1 %vm288_vm2, %v2172_v7 }
 0xbef   :  { %v2242_v11 = vpop.f32.mrf.mxu0 }
 0xbf0   :  { %v2319_v13 = vadd.f32 %v2242_v11, %v3146_v35 }
 0xbf1   :  { %v2750_v14 = vpop.f32.mrf.mxu0 }
 0xbf2   :  { %v2328_v15 = vadd.f32 %v2439_v12, %v2319_v13 }
 0xbf3   :  { %v2315_v16 = vpop.f32.mrf.mxu1 }
 0xbf4   :  { %2330 = vst.msk [vmem:[#allocation2] sm:$0xff] %vm42_vm0, %v2328_v15  ;;  %v2320_v17 = vadd.f32 %v2315_v16, %v3150_v38 }
 0xbf5   :  { %v2755_v18 = vpop.f32.mrf.mxu1 }
 0xbf6   :  { %v2329_v19 = vadd.f32 %v2439_v12, %v2320_v17 }
 0xbf8   :  { %2331 = vst.msk [vmem:[#allocation2 + $0x8] sm:$0xff] %vm42_vm0, %v2329_v19 }
 0xbf9   :  { %2804 = shalt.err (!%p2801_p4)
}
 0xbfa   :  { %s2818_s6 = smov 128   ;;  %s2819_s14 = smov 8  }
 0xbfb   :  { %2343 = dma.vmem_to_hbm [thread:$0]  %s2338_s12, 256, %s3205_s7, [#allocation3], %s2818_s6, %s2818_s6, %s2819_s14  }
 0xbfc   :  { %2813 = dma.done.wait [#allocation3], 256  }
 0xbfd   :  { %2814 = vsyncadd [#allocation3], 4294967040 }
 0xbfe   :  { %2347 = vsyncpa [#allocation3], 1 }

</bundles_post_ra>
